<compile_context>
chip_gen: v7x
topology: tpu7x:2x2x1
jax: 0.10.0
libtpu: 0.0.40
codegen_flags: <defaults>
</compile_context>

<pallas_src>
import math

import jax
import jax.numpy as jnp
from jax.experimental import pallas as pl
from jax.experimental.pallas import tpu as pltpu


# ----------------------------------------------------------------------------
# Kernels
# ----------------------------------------------------------------------------
def _make_resident_kernel(n_classes, n_mc, want_ep):
    """MC samples resident in the block: block = (M, [N squeezed], C, TH, W)."""
    inv_m = 1.0 / float(n_mc)
    inv_logc = 1.0 / math.log(float(n_classes))
    tiny = float(jnp.finfo(jnp.float32).tiny)

    def kernel(logits_ref, *out_refs):
        if want_ep:
            ep_ref, npe_ref, mi_ref = out_refs
        else:
            npe_ref, mi_ref = out_refs

        x = logits_ref[...].astype(jnp.float32)            # (M, C, TH, W)

        # softmax over classes (axis=1), done in shifted space; the class and
        # MC axes are major block axes so every reduction is plain VPU work.
        mx = jnp.max(x, axis=1, keepdims=True)             # (M, 1, TH, W)
        shifted = x - mx
        e = jnp.exp(shifted)
        sum_e = jnp.sum(e, axis=1, keepdims=True)          # (M, 1, TH, W)
        inv = pl.reciprocal(sum_e, approx=False)           # one recip per (M,TH,W)
        probas = e * inv

        # sum_c p == 1  =>  sum_c p*log p = sum_c p*shifted - log(sum_e)
        mc_entropy = jnp.sum(probas * shifted, axis=1) - jnp.log(sum_e)[:, 0]  # (M,TH,W)
        expected_entropy = -jnp.sum(mc_entropy, axis=0) * inv_m                # (TH,W)

        expected_p = jnp.sum(probas, axis=0) * inv_m                           # (C,TH,W)
        log_ep = jnp.log(jnp.maximum(expected_p, tiny))
        predictive_entropy = -jnp.sum(expected_p * log_ep, axis=0)             # (TH,W)

        if want_ep:
            ep_ref[...] = expected_p.astype(ep_ref.dtype)
        npe_ref[...] = predictive_entropy * inv_logc
        mi_ref[...] = predictive_entropy - expected_entropy

    return kernel


def _make_stream_kernel(n_classes, n_mc, want_ep):
    """M streamed on an innermost 'arbitrary' grid axis with VMEM accumulators."""
    inv_m = 1.0 / float(n_mc)
    inv_logc = 1.0 / math.log(float(n_classes))
    tiny = float(jnp.finfo(jnp.float32).tiny)

    def kernel(logits_ref, *refs):
        if want_ep:
            ep_ref, npe_ref, mi_ref, acc_p, acc_mce = refs
        else:
            npe_ref, mi_ref, acc_p, acc_mce = refs

        m_idx = pl.program_id(2)

        @pl.when(m_idx == 0)
        def _init():
            acc_p[...] = jnp.zeros_like(acc_p)
            acc_mce[...] = jnp.zeros_like(acc_mce)

        x = logits_ref[...].astype(jnp.float32)            # (C, TH, W)
        mx = jnp.max(x, axis=0, keepdims=True)             # (1, TH, W)
        shifted = x - mx
        e = jnp.exp(shifted)
        sum_e = jnp.sum(e, axis=0, keepdims=True)          # (1, TH, W)
        inv = pl.reciprocal(sum_e, approx=False)
        probas = e * inv

        acc_p[...] += probas
        acc_mce[...] += jnp.sum(probas * shifted, axis=0) - jnp.log(sum_e)[0]

        @pl.when(m_idx == n_mc - 1)
        def _finalize():
            expected_p = acc_p[...] * inv_m                                    # (C,TH,W)
            expected_entropy = -acc_mce[...] * inv_m                           # (TH,W)
            log_ep = jnp.log(jnp.maximum(expected_p, tiny))
            predictive_entropy = -jnp.sum(expected_p * log_ep, axis=0)         # (TH,W)
            if want_ep:
                ep_ref[...] = expected_p.astype(ep_ref.dtype)
            npe_ref[...] = predictive_entropy * inv_logc
            mi_ref[...] = predictive_entropy - expected_entropy

    return kernel


# ----------------------------------------------------------------------------
# Sizing helpers
# ----------------------------------------------------------------------------
def _vmem_config():
    """(vmem_limit_bytes, live_set_budget_bytes), generation-aware."""
    phys = 64 * 1024 * 1024                      # conservative (v7x) default
    try:
        info = pltpu.get_tpu_info()
        phys = int(getattr(info, "vmem_capacity_bytes", phys))
    except Exception:
        pass
    if phys >= 128 * 1024 * 1024:
        # v5e / v6e: HBM-bound; big blocks + 64 MiB scoped limit reach roofline.
        vmem_limit = 64 * 1024 * 1024
    else:
        # v7x (64 MiB physical VMEM) or unknown: stay at the 32 MiB default.
        vmem_limit = 32 * 1024 * 1024
    return vmem_limit, int(vmem_limit * 0.6)     # headroom for compiler scratch


def _choose_tile_h(M, C, H, W, in_itemsize, ep_itemsize, budget_bytes, stream_m):
    """Largest H-tile (multiple of 8, dividing H) whose live set fits the budget.

    Intermediates are budgeted at f32 (4 B/elem) regardless of the input dtype;
    the double-buffered expected_p output block is included.  The largest
    fitting tile also maximizes per-(m,c) DMA chunk size (tile_h*W*itemsize),
    keeping strided-DMA chunks >= ~1 KiB when W is small.
    Returns 0 if even tile_h=8 does not fit.
    """
    if H % 8 != 0:
        return H                                  # full-extent block satisfies (8,128)
    if stream_m:
        per_row = (2 * C * W * in_itemsize        # double-buffered input block (1 sample)
                   + 3 * C * W * 4                # f32 intermediates (x, e, probas)
                   + (C + 1) * W * 4              # persistent accumulators
                   + 2 * C * W * ep_itemsize      # double-buffered expected_p out block
                   + 4 * W * 4)                   # npe / mi out blocks
    else:
        per_row = (2 * M * C * W * in_itemsize
                   + 3 * M * C * W * 4
                   + 2 * C * W * ep_itemsize
                   + 4 * W * 4)
    max_rows = budget_bytes // per_row
    tile, cand = 0, 8
    while cand <= H:
        if H % cand == 0 and cand <= max_rows:
            tile = cand
        cand += 8
    return tile


# ----------------------------------------------------------------------------
# Wrapper
# ----------------------------------------------------------------------------
def mc_inference_stats(logits_mc, *, tile_h=None, return_expected_p=True,
                       expected_p_dtype=jnp.float32, force_stream_m=False):
    """logits_mc: (M, N, C, H, W) float (f32 or bf16).

    Returns (expected_p, normed_pe, mi) if return_expected_p else (normed_pe, mi):
      expected_p : (N, C, H, W) expected_p_dtype   mean softmax over MC samples
      normed_pe  : (N, H, W)    float32            predictive entropy / log(C)
      mi         : (N, H, W)    float32            mutual information
    """
    M, N, C, H, W = logits_mc.shape
    if C == 1:
        # TODO(synk): sigmoid (binary) branch of logits_to_probabilities not kernelized.
        raise NotImplementedError("C == 1 sigmoid path not kernelized")

    in_itemsize = jnp.dtype(logits_mc.dtype).itemsize
    ep_itemsize = jnp.dtype(expected_p_dtype).itemsize if return_expected_p else 0
    vmem_limit, budget = _vmem_config()

    stream_m = bool(force_stream_m)
    if tile_h is None:
        if not stream_m:
            tile_h = _choose_tile_h(M, C, H, W, in_itemsize, ep_itemsize, budget, False)
            if tile_h == 0:
                stream_m = True                   # resident-M block can't fit VMEM
        if stream_m:
            tile_h = _choose_tile_h(M, C, H, W, in_itemsize, ep_itemsize, budget, True)
            if tile_h == 0:
                tile_h = 8 if H % 8 == 0 else H   # best effort
    else:
        if tile_h != H and (H % tile_h != 0 or tile_h % 8 != 0):
            tile_h = H                            # ragged-safe full-extent fallback

    if stream_m:
        grid = (N, H // tile_h, M)
        semantics = ("parallel", "parallel", "arbitrary")
        in_spec = pl.BlockSpec((pl.Squeezed(), pl.Squeezed(), C, tile_h, W),
                               lambda n, t, m: (m, n, 0, t, 0))
        ep_map = lambda n, t, m: (n, 0, t, 0)
        hw_map = lambda n, t, m: (n, t, 0)
        scratch = [pltpu.VMEM((C, tile_h, W), jnp.float32),
                   pltpu.VMEM((tile_h, W), jnp.float32)]
        kernel = _make_stream_kernel(C, M, return_expected_p)
    else:
        grid = (N, H // tile_h)
        semantics = ("parallel", "parallel")
        in_spec = pl.BlockSpec((M, pl.Squeezed(), C, tile_h, W),
                               lambda n, t: (0, n, 0, t, 0))
        ep_map = lambda n, t: (n, 0, t, 0)
        hw_map = lambda n, t: (n, t, 0)
        scratch = []
        kernel = _make_resident_kernel(C, M, return_expected_p)

    out_shape, out_specs = [], []
    if return_expected_p:
        out_shape.append(jax.ShapeDtypeStruct((N, C, H, W), expected_p_dtype))
        out_specs.append(pl.BlockSpec((pl.Squeezed(), C, tile_h, W), ep_map))
    out_shape.append(jax.ShapeDtypeStruct((N, H, W), jnp.float32))
    out_specs.append(pl.BlockSpec((pl.Squeezed(), tile_h, W), hw_map))
    out_shape.append(jax.ShapeDtypeStruct((N, H, W), jnp.float32))
    out_specs.append(pl.BlockSpec((pl.Squeezed(), tile_h, W), hw_map))

    return pl.pallas_call(
        kernel,
        out_shape=tuple(out_shape),
        grid_spec=pltpu.PrefetchScalarGridSpec(
            num_scalar_prefetch=0,
            grid=grid,
            in_specs=[in_spec],
            out_specs=out_specs,
            scratch_shapes=scratch,
        ),
        compiler_params=pltpu.CompilerParams(
            dimension_semantics=semantics,
            vmem_limit_bytes=vmem_limit,
        ),
    )(logits_mc)


# ----------------------------------------------------------------------------
# Reference + self-test
# ----------------------------------------------------------------------------
def _reference(logits_mc):
    """Pure-JAX reference mirroring the PyTorch code exactly."""
    M, N, C, H, W = logits_mc.shape
    probas = jax.nn.softmax(logits_mc.astype(jnp.float32), axis=2)  # softmax dim=1 of NCHW
    expected_p = jnp.mean(probas, axis=0)                           # (N, C, H, W)
    predictive_entropy = -jnp.sum(expected_p * jnp.log(expected_p), axis=1)
    mc_entropy = jnp.sum(probas * jnp.log(probas), axis=2)
    expected_entropy = -jnp.mean(mc_entropy, axis=0)
    normed_pe = predictive_entropy / jnp.log(float(C))
    mi = predictive_entropy - expected_entropy
    return expected_p, normed_pe, mi


if __name__ == "__main__":
    # Small deterministic shapes: M=4 MC samples, batch=2, classes=4, 16x16 patch.
    key = jax.random.PRNGKey(0)
    M, N, C, H, W = 4, 2, 4, 16, 16
    logits_mc = jax.random.normal(key, (M, N, C, H, W), dtype=jnp.float32)

    ref_p, ref_npe, ref_mi = _reference(logits_mc)

    # 1) Resident-M kernel with explicit spatial tiling (grid = (N, 2)).
    ep, npe, mi = mc_inference_stats(logits_mc, tile_h=8)
    jax.block_until_ready((ep, npe, mi))
    assert jnp.allclose(ep, ref_p, atol=1e-5, rtol=1e-5)
    assert jnp.allclose(npe, ref_npe, atol=1e-5, rtol=1e-5)
    assert jnp.allclose(mi, ref_mi, atol=1e-5, rtol=1e-5)

    # 2) Streaming-M fallback path (innermost "arbitrary" MC axis, VMEM accumulators).
    ep_s, npe_s, mi_s = mc_inference_stats(logits_mc, tile_h=8, force_stream_m=True)
    jax.block_until_ready((ep_s, npe_s, mi_s))
    assert jnp.allclose(ep_s, ref_p, atol=1e-5, rtol=1e-5)
    assert jnp.allclose(npe_s, ref_npe, atol=1e-5, rtol=1e-5)
    assert jnp.allclose(mi_s, ref_mi, atol=1e-5, rtol=1e-5)

    # 3) Uncertainty-only path: skip the expected_p writeback (cuts HBM store traffic).
    npe_u, mi_u = mc_inference_stats(logits_mc, return_expected_p=False)
    jax.block_until_ready((npe_u, mi_u))
    assert jnp.allclose(npe_u, ref_npe, atol=1e-5, rtol=1e-5)
    assert jnp.allclose(mi_u, ref_mi, atol=1e-5, rtol=1e-5)

    print("KERNEL_OK")
</pallas_src>

<mosaic_0001>
module attributes {stable_mosaic.version = 11 : i64} {
  func.func @kernel(%arg0: i32, %arg1: i32, %arg2: memref<4x1x4x8x16xf32, #tpu.memory_space<vmem>>, %arg3: memref<1x4x8x16xf32, #tpu.memory_space<vmem>>, %arg4: memref<1x8x16xf32, #tpu.memory_space<vmem>>, %arg5: memref<1x8x16xf32, #tpu.memory_space<vmem>>) attributes {dimension_semantics = [#tpu.dimension_semantics<parallel>, #tpu.dimension_semantics<parallel>], iteration_bounds = array<i64: 2, 2>, scalar_prefetch = 0 : i64, scratch_operands = 0 : i64, tpu.core_type = #tpu.core_type<tc>, window_params = [{transform_indices = @transform_0, window_bounds = array<i64: 4, 1, 4, 8, 16>}, {transform_indices = @transform_1, window_bounds = array<i64: 1, 4, 8, 16>}, {transform_indices = @transform_2, window_bounds = array<i64: 1, 8, 16>}, {transform_indices = @transform_3, window_bounds = array<i64: 1, 8, 16>}]} {
    %c0 = arith.constant 0 : index
    %c0_0 = arith.constant 0 : index
    %c0_1 = arith.constant 0 : index
    %c0_2 = arith.constant 0 : index
    %c0_3 = arith.constant 0 : index
    %0 = vector.load %arg2[%c0, %c0_0, %c0_1, %c0_2, %c0_3] : memref<4x1x4x8x16xf32, #tpu.memory_space<vmem>>, vector<4x1x4x8x16xf32>
    %1 = vector.shape_cast %0 : vector<4x1x4x8x16xf32> to vector<4x4x8x16xf32>
    %cst = arith.constant dense<0xFF800000> : vector<4x8x16xf32>
    %2 = vector.multi_reduction <maximumf>, %1, %cst [1] : vector<4x4x8x16xf32> to vector<4x8x16xf32>
    %3 = vector.shape_cast %2 : vector<4x8x16xf32> to vector<4x1x8x16xf32>
    %4 = vector.broadcast %3 : vector<4x1x8x16xf32> to vector<4x4x8x16xf32>
    %5 = arith.subf %1, %4 : vector<4x4x8x16xf32>
    %6 = math.exp %5 : vector<4x4x8x16xf32>
    %cst_4 = arith.constant dense<0.000000e+00> : vector<4x8x16xf32>
    %7 = vector.multi_reduction <add>, %6, %cst_4 [1] : vector<4x4x8x16xf32> to vector<4x8x16xf32>
    %8 = vector.shape_cast %7 : vector<4x8x16xf32> to vector<4x1x8x16xf32>
    %9 = tpu.reciprocal %8 : vector<4x1x8x16xf32> -> vector<4x1x8x16xf32>
    %10 = vector.broadcast %9 : vector<4x1x8x16xf32> to vector<4x4x8x16xf32>
    %11 = arith.mulf %6, %10 : vector<4x4x8x16xf32>
    %12 = arith.mulf %11, %5 : vector<4x4x8x16xf32>
    %cst_5 = arith.constant dense<0.000000e+00> : vector<4x8x16xf32>
    %13 = vector.multi_reduction <add>, %12, %cst_5 [1] : vector<4x4x8x16xf32> to vector<4x8x16xf32>
    %14 = math.log %8 : vector<4x1x8x16xf32>
    %15 = vector.shape_cast %14 : vector<4x1x8x16xf32> to vector<4x8x16xf32>
    %16 = arith.subf %13, %15 : vector<4x8x16xf32>
    %cst_6 = arith.constant dense<0.000000e+00> : vector<8x16xf32>
    %17 = vector.multi_reduction <add>, %16, %cst_6 [0] : vector<4x8x16xf32> to vector<8x16xf32>
    %cst_7 = arith.constant 0.000000e+00 : f32
    %18 = vector.broadcast %cst_7 : f32 to vector<8x16xf32>
    %19 = arith.subf %18, %17 : vector<8x16xf32>
    %cst_8 = arith.constant 2.500000e-01 : f32
    %20 = vector.broadcast %cst_8 : f32 to vector<8x16xf32>
    %21 = arith.mulf %19, %20 : vector<8x16xf32>
    %cst_9 = arith.constant dense<0.000000e+00> : vector<4x8x16xf32>
    %22 = vector.multi_reduction <add>, %11, %cst_9 [0] : vector<4x4x8x16xf32> to vector<4x8x16xf32>
    %cst_10 = arith.constant 2.500000e-01 : f32
    %23 = vector.broadcast %cst_10 : f32 to vector<4x8x16xf32>
    %24 = arith.mulf %22, %23 : vector<4x8x16xf32>
    %cst_11 = arith.constant 1.17549435E-38 : f32
    %25 = vector.broadcast %cst_11 : f32 to vector<4x8x16xf32>
    %26 = arith.maximumf %24, %25 : vector<4x8x16xf32>
    %27 = math.log %26 : vector<4x8x16xf32>
    %28 = arith.mulf %24, %27 : vector<4x8x16xf32>
    %cst_12 = arith.constant dense<0.000000e+00> : vector<8x16xf32>
    %29 = vector.multi_reduction <add>, %28, %cst_12 [0] : vector<4x8x16xf32> to vector<8x16xf32>
    %cst_13 = arith.constant 0.000000e+00 : f32
    %30 = vector.broadcast %cst_13 : f32 to vector<8x16xf32>
    %31 = arith.subf %30, %29 : vector<8x16xf32>
    %c0_14 = arith.constant 0 : index
    %c0_15 = arith.constant 0 : index
    %c0_16 = arith.constant 0 : index
    %c0_17 = arith.constant 0 : index
    %32 = vector.load %arg3[%c0_14, %c0_15, %c0_16, %c0_17] : memref<1x4x8x16xf32, #tpu.memory_space<vmem>>, vector<1x4x8x16xf32>
    %33 = vector.shape_cast %32 : vector<1x4x8x16xf32> to vector<4x8x16xf32>
    %34 = vector.shape_cast %24 : vector<4x8x16xf32> to vector<1x4x8x16xf32>
    tpu.vector_store %arg3[%c0_14, %c0_15, %c0_16, %c0_17], %34 {strides = array<i32>} : memref<1x4x8x16xf32, #tpu.memory_space<vmem>>, vector<1x4x8x16xf32>,
    %cst_18 = arith.constant 0.72134751 : f32
    %35 = vector.broadcast %cst_18 : f32 to vector<8x16xf32>
    %36 = arith.mulf %31, %35 : vector<8x16xf32>
    %c0_19 = arith.constant 0 : index
    %c0_20 = arith.constant 0 : index
    %c0_21 = arith.constant 0 : index
    %37 = vector.load %arg4[%c0_19, %c0_20, %c0_21] : memref<1x8x16xf32, #tpu.memory_space<vmem>>, vector<1x8x16xf32>
    %38 = vector.shape_cast %37 : vector<1x8x16xf32> to vector<8x16xf32>
    %39 = vector.shape_cast %36 : vector<8x16xf32> to vector<1x8x16xf32>
    tpu.vector_store %arg4[%c0_19, %c0_20, %c0_21], %39 {strides = array<i32>} : memref<1x8x16xf32, #tpu.memory_space<vmem>>, vector<1x8x16xf32>,
    %40 = arith.subf %31, %21 : vector<8x16xf32>
    %c0_22 = arith.constant 0 : index
    %c0_23 = arith.constant 0 : index
    %c0_24 = arith.constant 0 : index
    %41 = vector.load %arg5[%c0_22, %c0_23, %c0_24] : memref<1x8x16xf32, #tpu.memory_space<vmem>>, vector<1x8x16xf32>
    %42 = vector.shape_cast %41 : vector<1x8x16xf32> to vector<8x16xf32>
    %43 = vector.shape_cast %40 : vector<8x16xf32> to vector<1x8x16xf32>
    tpu.vector_store %arg5[%c0_22, %c0_23, %c0_24], %43 {strides = array<i32>} : memref<1x8x16xf32, #tpu.memory_space<vmem>>, vector<1x8x16xf32>,
    return
  }
  func.func @transform_0(%arg0: i32, %arg1: i32) -> (i32, i32, i32, i32, i32) {
    %c0_i32 = arith.constant 0 : i32
    %c0_i32_0 = arith.constant 0 : i32
    %c0_i32_1 = arith.constant 0 : i32
    %c0_i32_2 = arith.constant 0 : i32
    return %c0_i32, %arg0, %c0_i32_0, %arg1, %c0_i32_1 : i32, i32, i32, i32, i32
  }
  func.func @transform_1(%arg0: i32, %arg1: i32) -> (i32, i32, i32, i32) {
    %c0_i32 = arith.constant 0 : i32
    %c0_i32_0 = arith.constant 0 : i32
    %c0_i32_1 = arith.constant 0 : i32
    return %arg0, %c0_i32, %arg1, %c0_i32_0 : i32, i32, i32, i32
  }
  func.func @transform_2(%arg0: i32, %arg1: i32) -> (i32, i32, i32) {
    %c0_i32 = arith.constant 0 : i32
    %c0_i32_0 = arith.constant 0 : i32
    return %arg0, %arg1, %c0_i32 : i32, i32, i32
  }
  func.func @transform_3(%arg0: i32, %arg1: i32) -> (i32, i32, i32) {
    %c0_i32 = arith.constant 0 : i32
    %c0_i32_0 = arith.constant 0 : i32
    return %arg0, %arg1, %c0_i32 : i32, i32, i32
  }
}

</mosaic_0001>

<bundles_post_ra>
// kernel: tpu_custom_call.1
= control target key start
LH: loop header
LB: loop body
LE: loop exit
PB: predicated region body
PF: predicated region fallthrough
CT: control target
= control target key end

     0   :  { %9 = vsyncpa [#allocation3], 0  ;;  %s1608_s0 = inlined_call_operand.hbm [shape: f32[4,2,4,16,16], index: 0, kind: input, shape index: {}]   ;;  %s1609_s1 = inlined_call_operand.hbm [shape: f32[2,4,16,16], index: 1, kind: output, shape index: {0}]   ;;  %s1610_s2 = inlined_call_operand.hbm [shape: f32[2,16,16], index: 2, kind: output, shape index: {1}]   ;;  %s1611_s3 = inlined_call_operand.hbm [shape: f32[2,16,16], index: 3, kind: output, shape index: {2}]  }
   0x1   :  { %11 = vsyncpa [#allocation3 + $0x1], 0 }
   0x2   :  { %12 = vsyncpa [#allocation4], 0 }
   0x3   :  { %14 = vsyncpa [#allocation4 + $0x1], 0 }
   0x4   :  { %15 = vsyncpa [#allocation7], 0 }
   0x5   :  { %17 = vsyncpa [#allocation7 + $0x1], 0  ;;  %s1105_s12 = smov 0   ;;  %s1107_s13 = smov 0  }
   0x6   :  { %s1109_s14 = smov 0   ;;  %s1111_s15 = smov 0  }
   0x7   :  { %s1113_s16 = smov 0   ;;  %s1115_s17 = smov 0  }
   0x8   :  { %s1117_s18 = smov 0   ;;  %s1119_s19 = smov 0  }
   0x9 LB: > { %1616 = sst [smem:[#allocation15_spill]] %s1066_s18  ;;  %s1146_s20 = sadd.s32 4294967295, %s1070_s19   ;;  %s1070_s19 = sphi %s1119_s19, %s23_s19   ;;  %s1066_s18 = sphi %s1117_s18, %s1626_s18   ;;  %s1062_s17 = sphi %s1115_s17, %s1631_s17   ;;  %s1058_s16 = sphi %s1113_s16, %s1624_s16   ;;  %s1054_s15 = sphi %s1111_s15, %s1630_s15   ;;  %s1050_s14 = sphi %s1109_s14, %s1629_s14   ;;  %s1046_s13 = sphi %s1107_s13, %s1628_s13   ;;  %s1042_s12 = sphi %s1105_s12, %s1627_s12  }
   0xa   : > { %s1612_s21 = sadd.s32 4294967294, %s1070_s19   ;;  %s32_s22 = sadd.s32 1, %s1062_s17 }
   0xb   : > { %p33_p0 = scmp.ge.s32.totalorder %s32_s22, 2  ;;  %s35_s23 = sadd.s32 1, %s1066_s18 }
   0xc   : > { %p51_p1 = scmp.ne.s32.totalorder %s1050_s14, %s1046_s13  ;;  %p52_p2 = scmp.eq.s32.totalorder %s1070_s19, 0 }
   0xd   : > { %s1633_s22 = smov (%p33_p0, %s32_s22), 0  ;;  %s1635_s23 = smov (!%p33_p0, %s35_s23), %s1066_s18 }
   0xe   : > { %1617 = sst [smem:[#allocation16_spill]] %s1633_s22  ;;  %s40_s24 = ssub.s32 %s1062_s17, %s1633_s22 }
   0xf   : > { %p1159_p3 = por %p52_p2, %p51_p1  ;;  %p37_p4 = scmp.ge.s32.totalorder %s1635_s23, 2 }
  0x10   : > { %p57_p5 = scmp.ne.s32.totalorder %s1046_s13, %s1042_s12  ;;  %p58_p6 = scmp.eq.s32.totalorder %s1146_s20, 0 }
  0x11   : > { %p83_p7 = scmp.eq.s32.totalorder %s1146_s20, 3  ;;  %s1637_s23 = smov (%p37_p4, %s1635_s23), 0 }
  0x12   : > { %1619 = sst [smem:[#allocation17_spill]] %s1637_s23  ;;  %p1169_p8 = por %p58_p6, %p57_p5 }
  0x13   : > { %p1173_p9 = por %p83_p7, %p51_p1  ;;  %s39_s28 = ssub.s32 %s1066_s18, %s1637_s23 }
  0x14   : > { %p89_p10 = scmp.eq.s32.totalorder %s1612_s21, 3  ;;  %s41_s29 = sor.u32 %s40_s24, %s39_s28 }
  0x15   : > { %s44_s30 = sadd.s32 1, %s1050_s14  ;;  %p42_p11 = scmp.eq.s32.totalorder %s41_s29, 0 }
  0x16   : > { %p1182_p12 = por %p89_p10, %p57_p5  ;;  %p734_p13 = scmp.ge.s32.totalorder %s1070_s19, 4 }
  0x17   : > { %s1187_s5 = scalar_select %p42_p11, %s1050_s14, %s44_s30  }
  0x18   : > { %161 = sbr.rel (%p734_p13) target bundleno = 46 (0x2e), region = 16 }
  0x1f   : > { %s165_s6 = sand.u32 1, %s1050_s14   ;;  %s736_s7 = sshll.u32 %s1066_s18, 3 }
  0x20   : > { %s735_s8 = sshll.u32 %s165_s6, 7  ;;  %s174_s9 = sadd.s32 %s1062_s17, %s736_s7 }
  0x21   : > { %s737_s10 = sshll.u32 %s174_s9, 7  ;;  %s169_s11 = scalar_lea.vmem [#allocation2], %s735_s8 }
  0x22   : > { %s189_s24 = sshll.u32 %s169_s11, 4  ;;  %s176_s30 = scalar_lea.hbm %s1608_s0, %s737_s10  ;;  %s190_s24 = int_to_ptr.vmem [resolvable:$true] %s189_s24 }
  0x23   : > { %s756_s21 = scalar_select %p1159_p3, [#allocation0], [#allocation11] }
  0x24   : > { %s1072_s22 = smov 2048   ;;  %s1073_s18 = smov 512  }
  0x25   : > { %s181_s23 = sld [smem:[%s756_s21]]   ;;  %s1074_s7 = smov 4  }
  0x26   : > { %757 = sst [smem:[#allocation10]] (%p1159_p3), %s1072_s22  ;;  %s1075_s8 = smov 256  }
  0x27   : > { %758 = sst [smem:[#allocation10 + $0x1]] (%p1159_p3), %s1073_s18  ;;  %s1076_s9 = smov 128  }
  0x28   : > { %759 = sst [smem:[#allocation10 + $0x2]] (%p1159_p3), %s1074_s7  ;;  %s1077_s10 = smov 8  }
  0x29   : > { %760 = sst [smem:[#allocation10 + $0x3]] (%p1159_p3), %s1075_s8  ;;  %s166_s28 = scalar_lea.sflag [#allocation3], %s165_s6 }
  0x2a   : > { %761 = sst [smem:[#allocation10 + $0x4]] (%p1159_p3), %s1076_s9  ;;  %s1078_s29 = smov [#allocation9]  }
  0x2b   : > { %762 = sst [smem:[#allocation10 + $0x5]] (%p1159_p3), %s1077_s10  ;;  %s738_s21 = sshll.u32 %s181_s23, 26 }
  0x2c   : > { %s739_s11 = sadd.s32 134217728, %s738_s21 }
  0x2d   : > { %763 = dma.general (%p1159_p3), %s176_s30, 2048, %s190_s24, %s166_s28, %s1078_s29, [#allocation10], %s739_s11, 0  }
  0x2e PF: > { %p740_p0 = scmp.ge.s32.totalorder %s1070_s19, 1  ;;  %p210_p1 = scmp.lt.s32.totalorder %s1070_s19, 5 }
  0x30   : > { %p211_p2 = pnand %p740_p0, %p210_p1 }
  0x31   : > { %s1215_s18 = sand.u32 (!%p211_p2), 1, %s1046_s13  }
  0x32   : > { %214 = sbr.rel (%p211_p2) target bundleno = 197 (0xc5), region = 24  ;;  %s741_s22 = sshll.u32 (!%p211_p2), %s1215_s18, 7 }
  0x33   : > { %s217_s23 = scalar_lea.sflag (!%p211_p2), [#allocation3], %s1215_s18  ;;  %s1219_s7 = scalar_lea.vmem (!%p211_p2), [#allocation2], %s741_s22 }
  0x39   : > { %1029 = dma.done.wait (%p1169_p8), %s217_s23, 2048  }
  0x3a   : > { %1031 = vsyncadd (%p1169_p8), %s217_s23, 4294965248  ;;  %vm269_vm0 = vcmask 130048   ;;  %v253_v0 = vld [vmem:[%s1219_s7] sm:$0xff]  ;;  %v254_v1 = vld [vmem:[%s1219_s7 + $0x8] sm:$0xff]  ;;  %s742_s25 = sshll.u32 %s1215_s18, 5  ;;  %s748_s26 = sshll.u32 %s1058_s16, 3 }
  0x3b   : > { %v255_v2 = vld [vmem:[%s1219_s7 + $0x10] sm:$0xff]  ;;  %v256_v3 = vld [vmem:[%s1219_s7 + $0x18] sm:$0xff]  ;;  %v257_v4 = vld [vmem:[%s1219_s7 + $0x20] sm:$0xff]  ;;  %v270_v6 = vsel %vm269_vm0, %v253_v0, -inf  ;;  %v271_v7 = vsel %vm269_vm0, %v254_v1, -inf  ;;  %s1377_s6 = sadd.s32 %s1054_s15, %s748_s26  ;;  %s1389_s24 = scalar_lea.vmem [#allocation5], %s742_s25 }
  0x3c   : > { %v258_v5 = vld [vmem:[%s1219_s7 + $0x28] sm:$0xff]  ;;  %v273_v8 = vsel %vm269_vm0, %v255_v2, -inf  ;;  %v259_v9 = vld [vmem:[%s1219_s7 + $0x30] sm:$0xff]  ;;  %v260_v10 = vld [vmem:[%s1219_s7 + $0x38] sm:$0xff]  ;;  %v272_v12 = vmax.f32 %v270_v6, %v271_v7  ;;  %v277_v13 = vsel %vm269_vm0, %v257_v4, -inf  ;;  %v275_v18 = vsel %vm269_vm0, %v256_v3, -inf }
  0x3d   : > { %v261_v11 = vld [vmem:[%s1219_s7 + $0x40] sm:$0xff]  ;;  %v278_v14 = vsel %vm269_vm0, %v258_v5, -inf  ;;  %v262_v15 = vld [vmem:[%s1219_s7 + $0x48] sm:$0xff]  ;;  %v263_v16 = vld [vmem:[%s1219_s7 + $0x50] sm:$0xff]  ;;  %v280_v20 = vsel %vm269_vm0, %v259_v9, -inf  ;;  %v282_v26 = vsel %vm269_vm0, %v260_v10, -inf }
  0x3e   : > { %v264_v17 = vld [vmem:[%s1219_s7 + $0x58] sm:$0xff]  ;;  %v279_v19 = vmax.f32 %v277_v13, %v278_v14  ;;  %v284_v21 = vsel %vm269_vm0, %v261_v11, -inf  ;;  %v265_v22 = vld [vmem:[%s1219_s7 + $0x60] sm:$0xff]  ;;  %v266_v23 = vld [vmem:[%s1219_s7 + $0x68] sm:$0xff]  ;;  %v274_v25 = vmax.f32 %v272_v12, %v273_v8  ;;  %v285_v27 = vsel %vm269_vm0, %v262_v15, -inf  ;;  %s548_s30 = sshll.u32 %s1389_s24, 4  ;;  %s1406_s30 = int_to_ptr.vmem [resolvable:$true] %s548_s30 }
  0x3f   : > { %v267_v24 = vld [vmem:[%s1219_s7 + $0x70] sm:$0xff]  ;;  %v287_v28 = vsel %vm269_vm0, %v263_v16, -inf  ;;  %v286_v30 = vmax.f32 %v284_v21, %v285_v27  ;;  %v291_v31 = vsel %vm269_vm0, %v265_v22, -inf  ;;  %v292_v32 = vsel %vm269_vm0, %v266_v23, -inf  ;;  %v268_v39 = vld [vmem:[%s1219_s7 + $0x78] sm:$0xff]  ;;  %s749_s8 = sshll.u32 %s1377_s6, 7 }
  0x40   : > { %v281_v29 = vmax.f32 %v279_v19, %v280_v20  ;;  %v276_v33 = vmax.f32 %v274_v25, %v275_v18  ;;  %v293_v34 = vmax.f32 %v291_v31, %v292_v32  ;;  %v289_v37 = vsel %vm269_vm0, %v264_v17, -inf  ;;  %s1429_s21 = scalar_lea.hbm %s1609_s1, %s749_s8  ;;  %s524_s11 = scalar_lea.sflag [#allocation4], %s1215_s18 }
  0x41   : > { %v288_v36 = vmax.f32 %v286_v30, %v287_v28  ;;  %v294_v38 = vsel %vm269_vm0, %v267_v24, -inf  ;;  %v296_v48 = vsel %vm269_vm0, %v268_v39, -inf  ;;  %s912_s28 = scalar_lea.vmem %s1406_s30, 512  ;;  %s1079_s29 = smov [#allocation5]  }
  0x42   : > { %v283_v35 = vmax.f32 %v281_v29, %v282_v26  ;;  %v1256_v40 = vsub.f32 %v253_v0, %v276_v33  ;;  %v1258_v41 = vsub.f32 %v254_v1, %v276_v33  ;;  %v1260_v42 = vsub.f32 %v255_v2, %v276_v33  ;;  %p913_p3 = scmp.ne.s32.totalorder %s1406_s30, %s912_s28  ;;  %s916_s22 = sshll.u32 %s1079_s29, 4  ;;  %s917_s22 = int_to_ptr.vmem [resolvable:$false] %s916_s22 }
  0x43   : > { %v1262_v43 = vsub.f32 %v256_v3, %v276_v33  ;;  %v290_v44 = vmax.f32 %v288_v36, %v289_v37  ;;  %v295_v45 = vmax.f32 %v293_v34, %v294_v38  ;;  %s918_s23 = scalar_lea.vmem %s917_s22, 1024  ;;  %p919_p6 = scmp.lt.s32.totalorder %s1406_s30, %s917_s22 }
  0x44   : > { %v1264_v46 = vsub.f32 %v257_v4, %v283_v35  ;;  %v314_v47 = vmul.f32 1.442695, %v1256_v40  ;;  %v1268_v49 = vsub.f32 %v258_v5, %v283_v35  ;;  %v1270_v50 = vsub.f32 %v259_v9, %v283_v35  ;;  %p914_p4 = pnand %p913_p3, %p1173_p9  ;;  %p920_p7 = scmp.lt.s32.totalorder %s918_s23, %s912_s28 }
  0x45   : > { %v1272_v51 = vsub.f32 %v260_v10, %v283_v35  ;;  %v316_v52 = vmul.f32 1.442695, %v1258_v41  ;;  %v318_v53 = vmul.f32 1.442695, %v1260_v42  ;;  %v320_v54 = vmul.f32 1.442695, %v1262_v43 }
  0x46   : > { %856 = vpow2.f32 %v314_v47  ;;  %v297_v55 = vmax.f32 %v295_v45, %v296_v48  ;;  %v1277_v56 = vsub.f32 %v261_v11, %v290_v44  ;;  %v322_v57 = vmul.f32 1.442695, %v1264_v46  ;;  %p915_p5 = pneg %p914_p4  ;;  %p921_p8 = por %p920_p7, %p919_p6 }
  0x47   : > { %v1280_v58 = vsub.f32 %v262_v15, %v290_v44  ;;  %858 = vpow2.f32 %v316_v52  ;;  %v324_v59 = vmul.f32 1.442695, %v1268_v49  ;;  %v1283_v60 = vsub.f32 %v263_v16, %v290_v44 }
  0x48   : > { %860 = vpow2.f32 %v318_v53  ;;  %v326_v61 = vmul.f32 1.442695, %v1270_v50  ;;  %v1286_v62 = vsub.f32 %v264_v17, %v290_v44  ;;  %v328_v63 = vmul.f32 1.442695, %v1272_v51  ;;  %p922_p10 = pnand %p921_p8, %p915_p5 }
  0x49   : > { %862 = vpow2.f32 %v320_v54  ;;  %v1289_v0 = vsub.f32 %v265_v22, %v297_v55  ;;  %v330_v1 = vmul.f32 1.442695, %v1277_v56  ;;  %v1292_v2 = vsub.f32 %v266_v23, %v297_v55 }
  0x4a   : > { %864 = vpow2.f32 %v322_v57  ;;  %v332_v3 = vmul.f32 1.442695, %v1280_v58  ;;  %v1295_v4 = vsub.f32 %v267_v24, %v297_v55  ;;  %v334_v5 = vmul.f32 1.442695, %v1283_v60 }
  0x4b   : > { %866 = vpow2.f32 %v324_v59  ;;  %v1298_v6 = vsub.f32 %v268_v39, %v297_v55  ;;  %v336_v7 = vmul.f32 1.442695, %v1286_v62  ;;  %v338_v8 = vmul.f32 1.442695, %v1289_v0 }
  0x4c   : > { %868 = vpow2.f32 %v326_v61  ;;  %v340_v10 = vmul.f32 1.442695, %v1292_v2  ;;  %v342_v11 = vmul.f32 1.442695, %v1295_v4 }
  0x4d   : > { %870 = vpow2.f32 %v328_v63  ;;  %v344_v14 = vmul.f32 1.442695, %v1298_v6 }
  0x4e   : > { %872 = vpow2.f32 %v330_v1 }
  0x4f   : > { %874 = vpow2.f32 %v332_v3 }
  0x50   : > { %v857_v9 = vpop.eup %856  ;;  %876 = vpow2.f32 %v334_v5 }
  0x51   : > { %v346_v12 = vsel %vm269_vm0, %v857_v9, 0.0  ;;  %v859_v13 = vpop.eup %858  ;;  %878 = vpow2.f32 %v336_v7 }
  0x52   : > { %v861_v15 = vpop.eup %860  ;;  %880 = vpow2.f32 %v338_v8  ;;  %v347_v16 = vsel %vm269_vm0, %v859_v13, 0.0 }
  0x53   : > { %v863_v17 = vpop.eup %862  ;;  %882 = vpow2.f32 %v340_v10  ;;  %v348_v18 = vadd.f32 %v347_v16, %v346_v12  ;;  %v349_v19 = vsel %vm269_vm0, %v861_v15, 0.0 }
  0x54   : > { %v865_v20 = vpop.eup %864  ;;  %884 = vpow2.f32 %v342_v11  ;;  %v351_v21 = vsel %vm269_vm0, %v863_v17, 0.0 }
  0x55   : > { %v867_v22 = vpop.eup %866  ;;  %886 = vpow2.f32 %v344_v14  ;;  %v350_v23 = vadd.f32 %v349_v19, %v348_v18  ;;  %v353_v24 = vsel %vm269_vm0, %v865_v20, 0.0 }
  0x56   : > { %v869_v25 = vpop.eup %868  ;;  %v354_v26 = vsel %vm269_vm0, %v867_v22, 0.0 }
  0x57   : > { %v871_v27 = vpop.eup %870  ;;  %v352_v28 = vadd.f32 %v351_v21, %v350_v23  ;;  %v355_v29 = vadd.f32 %v354_v26, %v353_v24  ;;  %v356_v30 = vsel %vm269_vm0, %v869_v25, 0.0 }
  0x58   : > { %v1312_v31 = vpop.eup %872  ;;  %v358_v32 = vsel %vm269_vm0, %v871_v27, 0.0 }
  0x59   : > { %v1315_v33 = vpop.eup %874  ;;  %v357_v34 = vadd.f32 %v356_v30, %v355_v29  ;;  %v360_v35 = vsel %vm269_vm0, %v1312_v31, 0.0  ;;  %888 = vrcp.f32 %v352_v28 }
  0x5a   : > { %v877_v36 = vpop.eup %876  ;;  %v361_v37 = vsel %vm269_vm0, %v1315_v33, 0.0  ;;  %890 = vlog2.f32 %v352_v28 }
  0x5b   : > { %v879_v38 = vpop.eup %878  ;;  %v359_v39 = vadd.f32 %v358_v32, %v357_v34  ;;  %v362_v44 = vadd.f32 %v361_v37, %v360_v35  ;;  %v363_v45 = vsel %vm269_vm0, %v877_v36, 0.0 }
  0x5c   : > { %v1322_v47 = vpop.eup %880  ;;  %v365_v48 = vsel %vm269_vm0, %v879_v38, 0.0 }
  0x5d   : > { %v1325_v52 = vpop.eup %882  ;;  %v364_v53 = vadd.f32 %v363_v45, %v362_v44  ;;  %v367_v54 = vsel %vm269_vm0, %v1322_v47, 0.0  ;;  %892 = vrcp.f32 %v359_v39 }
  0x5e   : > { %v1329_v55 = vpop.eup %884  ;;  %v368_v57 = vsel %vm269_vm0, %v1325_v52, 0.0 }
  0x5f   : > { %v1333_v59 = vpop.eup %886  ;;  %v366_v61 = vadd.f32 %v365_v48, %v364_v53  ;;  %v369_v63 = vadd.f32 %v368_v57, %v367_v54  ;;  %v370_v1 = vsel %vm269_vm0, %v1329_v55, 0.0 }
  0x60   : > { %v372_v3 = vsel %vm269_vm0, %v1333_v59, 0.0 }
  0x61   : > { %v371_v5 = vadd.f32 %v370_v1, %v369_v63  ;;  %894 = vrcp.f32 %v366_v61 }
  0x62   : > { %896 = vlog2.f32 %v359_v39 }
  0x63   : > { %v889_v7 = vpop.eup %888  ;;  %v1339_v8 = vadd.f32 %v372_v3, %v371_v5 }
  0x64   : > { %v891_v10 = vpop.eup %890  ;;  %v378_v11 = vmul.f32 %v889_v7, %v857_v9  ;;  %v379_v12 = vmul.f32 %v889_v7, %v859_v13  ;;  %v380_v14 = vmul.f32 %v889_v7, %v861_v15  ;;  %v381_v16 = vmul.f32 %v889_v7, %v863_v17 }
  0x65   : > { %898 = vrcp.f32 %v1339_v8  ;;  %v1344_v21 = vmul.f32 0.6931472, %v891_v10 }
  0x66   : > { %v459_v18 = vsel %vm269_vm0, %v378_v11, 0.0  ;;  %v466_v19 = vsel %vm269_vm0, %v379_v12, 0.0  ;;  %900 = vlog2.f32 %v366_v61  ;;  %v473_v24 = vsel %vm269_vm0, %v380_v14, 0.0 }
  0x67   : > { %v893_v23 = vpop.eup %892  ;;  %v480_v26 = vsel %vm269_vm0, %v381_v16, 0.0  ;;  %v394_v9 = vmul.f32 %v378_v11, %v1256_v40  ;;  %v395_v13 = vmul.f32 %v379_v12, %v1258_v41  ;;  %v396_v30 = vmul.f32 %v380_v14, %v1260_v42 }
  0x68   : > { %v382_v15 = vmul.f32 %v893_v23, %v865_v20  ;;  %v383_v17 = vmul.f32 %v893_v23, %v867_v22  ;;  %v384_v28 = vmul.f32 %v893_v23, %v869_v25  ;;  %v385_v29 = vmul.f32 %v893_v23, %v871_v27 }
  0x69   : > { %v397_v32 = vmul.f32 %v381_v16, %v1262_v43  ;;  %v1353_v34 = vsel %vm269_vm0, %v394_v9, 0.0  ;;  %v411_v35 = vsel %vm269_vm0, %v395_v13, 0.0  ;;  %v413_v61 = vsel %vm269_vm0, %v396_v30, 0.0 }
  0x6a   : > { %v460_v37 = vsel %vm269_vm0, %v382_v15, 0.0  ;;  %v467_v40 = vsel %vm269_vm0, %v383_v17, 0.0  ;;  %v474_v41 = vsel %vm269_vm0, %v384_v28, 0.0  ;;  %v481_v20 = vsel %vm269_vm0, %v385_v29, 0.0 }
  0x6b   : > { %v895_v22 = vpop.eup %894  ;;  %v461_v25 = vadd.f32 %v460_v37, %v459_v18  ;;  %v468_v42 = vadd.f32 %v467_v40, %v466_v19  ;;  %v475_v27 = vadd.f32 %v474_v41, %v473_v24  ;;  %v482_v43 = vadd.f32 %v481_v20, %v480_v26 }
  0x6c   : > { %v386_v39 = vmul.f32 %v895_v22, %v1312_v31  ;;  %v387_v44 = vmul.f32 %v895_v22, %v1315_v33  ;;  %v388_v45 = vmul.f32 %v895_v22, %v877_v36  ;;  %v389_v48 = vmul.f32 %v895_v22, %v879_v38  ;;  %v1364_v53 = vpop.eup %896 }
  0x6d   : > { %v398_v54 = vmul.f32 %v382_v15, %v1264_v46  ;;  %v399_v57 = vmul.f32 %v383_v17, %v1268_v49  ;;  %v1370_v63 = vsel %vm269_vm0, %v397_v32, 0.0  ;;  %v400_v16 = vmul.f32 %v384_v28, %v1270_v50 }
  0x6e   : > { %v462_v31 = vsel %vm269_vm0, %v386_v39, 0.0  ;;  %v469_v33 = vsel %vm269_vm0, %v387_v44, 0.0  ;;  %v476_v36 = vsel %vm269_vm0, %v388_v45, 0.0  ;;  %v483_v38 = vsel %vm269_vm0, %v389_v48, 0.0 }
  0x6f   : > { %v899_v1 = vpop.eup %898  ;;  %v463_v3 = vadd.f32 %v462_v31, %v461_v25  ;;  %v470_v5 = vadd.f32 %v469_v33, %v468_v42  ;;  %v477_v46 = vadd.f32 %v476_v36, %v475_v27  ;;  %v484_v7 = vadd.f32 %v483_v38, %v482_v43 }
  0x70   : > { %v1379_v49 = vpop.eup %900  ;;  %v390_v10 = vmul.f32 %v899_v1, %v1322_v47  ;;  %v391_v11 = vmul.f32 %v899_v1, %v1325_v52  ;;  %v392_v12 = vmul.f32 %v899_v1, %v1329_v55  ;;  %v1385_v14 = vmul.f32 %v899_v1, %v1333_v59 }
  0x71   : > { %v1394_v18 = vmul.f32 %v385_v29, %v1272_v51  ;;  %v402_v19 = vmul.f32 %v386_v39, %v1277_v56  ;;  %v1398_v47 = vmul.f32 %v387_v44, %v1280_v58  ;;  %v404_v56 = vmul.f32 %v388_v45, %v1283_v60 }
  0x72   : > { %v464_v52 = vsel %vm269_vm0, %v390_v10, 0.0  ;;  %v471_v55 = vsel %vm269_vm0, %v391_v11, 0.0  ;;  %v478_v59 = vsel %vm269_vm0, %v392_v12, 0.0  ;;  %v485_v23 = vsel %vm269_vm0, %v1385_v14, 0.0 }
  0x73   : > { %v465_v24 = vadd.f32 %v464_v52, %v463_v3  ;;  %v472_v50 = vadd.f32 %v471_v55, %v470_v5  ;;  %v479_v26 = vadd.f32 %v478_v59, %v477_v46  ;;  %v486_v51 = vadd.f32 %v485_v23, %v484_v7 }
  0x74   : > { %v1410_v58 = vmul.f32 %v389_v48, %v1286_v62  ;;  %v1413_v9 = vmul.f32 %v390_v10, %v1289_v0  ;;  %v1416_v13 = vmul.f32 %v391_v11, %v1292_v2  ;;  %v1432_v62 = vmul.f32 %v392_v12, %v1295_v4 }
  0x75   : > { %v1418_v15 = vmul.f32 0.25, %v465_v24  ;;  %v1420_v17 = vmul.f32 0.25, %v472_v50  ;;  %v1422_v28 = vmul.f32 0.25, %v479_v26  ;;  %v1424_v60 = vmul.f32 0.25, %v486_v51 }
  0x76   : > { %v412_v0 = vadd.f32 %v411_v35, %v1353_v34  ;;  %v417_v2 = vsel %vm269_vm0, %v398_v54, 0.0  ;;  %v418_v29 = vsel %vm269_vm0, %v399_v57, 0.0  ;;  %v420_v4 = vsel %vm269_vm0, %v400_v16, 0.0 }
  0x77   : > { %v491_v30 = vmax.f32 %v1418_v15, 1.1754944e-38  ;;  %v492_v32 = vmax.f32 %v1420_v17, 1.1754944e-38  ;;  %v493_v37 = vmax.f32 %v1422_v28, 1.1754944e-38  ;;  %515 = vst.msk [vmem:[%s1389_s24] sm:$0xff] %vm269_vm0, %v1418_v15  ;;  %516 = vst.msk [vmem:[%s1389_s24 + $0x8] sm:$0xff] %vm269_vm0, %v1420_v17  ;;  %v494_v34 = vmax.f32 %v1424_v60, 1.1754944e-38 }
  0x78   : > { %517 = vst.msk [vmem:[%s1389_s24 + $0x10] sm:$0xff] %vm269_vm0, %v1422_v28  ;;  %518 = vst.msk [vmem:[%s1389_s24 + $0x18] sm:$0xff] %vm269_vm0, %v1424_v60  ;;  %v414_v35 = vadd.f32 %v413_v61, %v412_v0  ;;  %v419_v40 = vadd.f32 %v418_v29, %v417_v2  ;;  %v424_v41 = vsel %vm269_vm0, %v402_v19, 0.0 }
  0x79   : > { %925 = shalt.err (!%p922_p10)
}
  0x7a   : > { %s926_s7 = scalar_lea.hbm %s1429_s21, 512  ;;  %s930_s6 = scalar_lea.hbm %s1609_s1, 2048 }
  0x7b   : > { %p927_p11 = scmp.ne.s32.totalorder %s1429_s21, %s926_s7  ;;  %p931_p1 = scmp.lt.u32.totalorder %s1429_s21, %s1609_s1 }
  0x7c   : > { %p932_p2 = scmp.lt.u32.totalorder %s930_s6, %s926_s7  ;;  %p934_p4 = scmp.lt.u32.totalorder %s926_s7, %s1429_s21 }
  0x7d   : > { %p928_p13 = pnand %p927_p11, %p1173_p9 }
  0x7e   : > { %p933_p3 = por %p932_p2, %p931_p1 }
  0x7f   : > { %p929_p0 = pneg %p928_p13 }
  0x80   : > { %p935_p5 = por %p934_p4, %p933_p3 }
  0x82   : > { %p936_p6 = pnand %p935_p5, %p929_p0 }
  0x84   : > { %939 = shalt.err (!%p936_p6)
}
  0x85   : > { %s1080_s9 = smov 128   ;;  %s1081_s10 = smov 256   ;;  %902 = vlog2.f32 %v491_v30  ;;  %v422_v20 = vsel %vm269_vm0, %v1394_v18, 0.0  ;;  %v425_v22 = vsel %vm269_vm0, %v1398_v47, 0.0  ;;  %v427_v25 = vsel %vm269_vm0, %v404_v56, 0.0 }
  0x86   : > { %s1082_s28 = smov 8   ;;  %904 = vlog2.f32 %v492_v32  ;;  %v416_v42 = vadd.f32 %v1370_v63, %v414_v35  ;;  %v421_v27 = vadd.f32 %v420_v4, %v419_v40  ;;  %v426_v43 = vadd.f32 %v425_v22, %v424_v41  ;;  %s528_s22 = sand.u32 1, %s1146_s20  }
  0x87   : > { %765 = dma.vmem_to_hbm [thread:$0]  (%p1173_p9), %s1406_s30, 512, %s1429_s21, %s524_s11, %s1080_s9, %s1081_s10, %s1082_s28   ;;  %906 = vlog2.f32 %v493_v37  ;;  %v429_v39 = vsel %vm269_vm0, %v1410_v58, 0.0  ;;  %v431_v44 = vsel %vm269_vm0, %v1413_v9, 0.0  ;;  %v432_v45 = vsel %vm269_vm0, %v1416_v13, 0.0 }
  0x88   : > { %908 = vlog2.f32 %v494_v34  ;;  %v423_v48 = vadd.f32 %v422_v20, %v421_v27  ;;  %v428_v54 = vadd.f32 %v427_v25, %v426_v43  ;;  %v441_v57 = vmul.f32 0.6931472, %v1364_v53  ;;  %s743_s30 = sshll.u32 %s1215_s18, 3  ;;  %s750_s21 = sshll.u32 %s1058_s16, 1 }
  0x89   : > { %910 = vlog2.f32 %v1339_v8  ;;  %v433_v63 = vadd.f32 %v432_v45, %v431_v44  ;;  %v443_v31 = vmul.f32 0.6931472, %v1379_v49  ;;  %v446_v33 = vsub.f32 %v416_v42, %v1344_v21  ;;  %s562_s18 = sadd.s32 %s1054_s15, %s750_s21  ;;  %s245_s11 = scalar_lea.vmem [#allocation6], %s743_s30 }
  0x8a   : > { %v430_v61 = vadd.f32 %v429_v39, %v428_v54  ;;  %v409_v36 = vmul.f32 %v1385_v14, %v1298_v6  ;;  %v434_v38 = vsel %vm269_vm0, %v1432_v62, 0.0  ;;  %v447_v1 = vsub.f32 %v423_v48, %v441_v57  ;;  %s566_s29 = sshll.u32 %s245_s11, 4  ;;  %s751_s23 = sshll.u32 %s562_s18, 7  ;;  %s1516_s29 = int_to_ptr.vmem [resolvable:$true] %s566_s29 }
  0x8b   : > { %v435_v3 = vadd.f32 %v434_v38, %v433_v63  ;;  %v450_v46 = vsel %vm269_vm0, %v446_v33, 0.0  ;;  %s252_s16 = scalar_lea.vmem [#allocation8], %s743_s30  ;;  %s1521_s15 = scalar_lea.hbm %s1610_s2, %s751_s23 }
  0x8c   : > { %v448_v5 = vsub.f32 %v430_v61, %v443_v31  ;;  %v451_v53 = vsel %vm269_vm0, %v447_v1, 0.0  ;;  %v436_v7 = vsel %vm269_vm0, %v409_v36, 0.0  ;;  %s581_s7 = sshll.u32 %s252_s16, 4  ;;  %s1528_s24 = scalar_lea.hbm %s1611_s3, %s751_s23  ;;  %s1523_s7 = int_to_ptr.vmem [resolvable:$true] %s581_s7 }
  0x8d   : > { %v452_v12 = vadd.f32 %v451_v53, %v450_v46  ;;  %v437_v18 = vadd.f32 %v436_v7, %v435_v3  ;;  %s1532_s8 = scalar_lea.sflag [#allocation7], %s528_s22  ;;  %s940_s9 = scalar_lea.vmem %s1516_s29, 128 }
  0x8e   : > { %v453_v19 = vsel %vm269_vm0, %v448_v5, 0.0  ;;  %p941_p7 = scmp.ne.s32.totalorder %s1516_s29, %s940_s9  ;;  %s1083_s10 = smov [#allocation6]  }
  0x8f   : > { %v903_v8 = vpop.eup %902  ;;  %v454_v51 = vadd.f32 %v453_v19, %v452_v12  ;;  %s944_s28 = sshll.u32 %s1083_s10, 4  ;;  %s945_s28 = int_to_ptr.vmem [resolvable:$false] %s944_s28 }
  0x90   : > { %v905_v49 = vpop.eup %904  ;;  %v496_v10 = vmul.f32 0.6931472, %v903_v8  ;;  %p942_p8 = pnand %p941_p7, %p1173_p9  ;;  %s946_s30 = scalar_lea.vmem %s945_s28, 256 }
  0x91   : > { %v907_v21 = vpop.eup %906  ;;  %v498_v11 = vmul.f32 0.6931472, %v905_v49  ;;  %p947_p11 = scmp.lt.s32.totalorder %s1516_s29, %s945_s28  ;;  %p948_p13 = scmp.lt.s32.totalorder %s946_s30, %s940_s9 }
  0x92   : > { %v909_v6 = vpop.eup %908  ;;  %v500_v14 = vmul.f32 0.6931472, %v907_v21  ;;  %v503_v16 = vmul.f32 %v496_v10, %v1418_v15  ;;  %p943_p10 = pneg %p942_p8 }
  0x93   : > { %v911_v47 = vpop.eup %910  ;;  %v502_v52 = vmul.f32 0.6931472, %v909_v6  ;;  %v504_v55 = vmul.f32 %v498_v11, %v1420_v17  ;;  %p949_p0 = por %p948_p13, %p947_p11 }
  0x94   : > { %v505_v59 = vmul.f32 %v500_v14, %v1422_v28  ;;  %v507_v23 = vsel %vm269_vm0, %v503_v16, 0.0  ;;  %v445_v24 = vmul.f32 0.6931472, %v911_v47 }
  0x95   : > { %v506_v50 = vmul.f32 %v502_v52, %v1424_v60  ;;  %v508_v26 = vsel %vm269_vm0, %v504_v55, 0.0  ;;  %p950_p1 = pnand %p949_p0, %p943_p10 }
  0x96   : > { %v509_v56 = vadd.f32 %v508_v26, %v507_v23  ;;  %v510_v58 = vsel %vm269_vm0, %v505_v59, 0.0  ;;  %v449_v9 = vsub.f32 %v437_v18, %v445_v24 }
  0x97   : > { %v512_v13 = vsel %vm269_vm0, %v506_v50, 0.0 }
  0x98   : > { %v511_v15 = vadd.f32 %v510_v58, %v509_v56  ;;  %v455_v17 = vsel %vm269_vm0, %v449_v9, 0.0 }
  0x99   : > { %v456_v28 = vadd.f32 %v455_v17, %v454_v51 }
  0x9a   : > { %v513_v62 = vadd.f32 %v512_v13, %v511_v15 }
  0x9b   : > { %v457_v60 = vsub.f32 0.0, %v456_v28 }
  0x9c   : > { %v514_v0 = vsub.f32 0.0, %v513_v62 }
  0x9d   : > { %v458_v2 = vmul.f32 0.25, %v457_v60 }
  0x9e   : > { %v519_v29 = vmul.f32 0.7213475, %v514_v0 }
  0x9f   : > { %v521_v30 = vsub.f32 %v514_v0, %v458_v2 }
  0xa0   : > { %520 = vst.msk [vmem:[%s245_s11] sm:$0xff] %vm269_vm0, %v519_v29 }
  0xa1   : > { %522 = vst.msk [vmem:[%s252_s16] sm:$0xff] %vm269_vm0, %v521_v30 }
  0xa2   : > { %953 = shalt.err (!%p950_p1)
}
  0xa3   : > { %s954_s21 = scalar_lea.hbm %s1521_s15, 128  ;;  %s958_s22 = scalar_lea.hbm %s1610_s2, 512 }
  0xa4   : > { %p955_p2 = scmp.ne.s32.totalorder %s1521_s15, %s954_s21  ;;  %p959_p5 = scmp.lt.u32.totalorder %s1521_s15, %s1610_s2 }
  0xa5   : > { %p960_p6 = scmp.lt.u32.totalorder %s958_s22, %s954_s21  ;;  %p962_p8 = scmp.lt.u32.totalorder %s954_s21, %s1521_s15 }
  0xa6   : > { %p956_p3 = pnand %p955_p2, %p1173_p9 }
  0xa7   : > { %p961_p7 = por %p960_p6, %p959_p5 }
  0xa8   : > { %p957_p4 = pneg %p956_p3 }
  0xa9   : > { %p963_p10 = por %p962_p8, %p961_p7 }
  0xab   : > { %p964_p11 = pnand %p963_p10, %p957_p4 }
  0xad   : > { %967 = shalt.err (!%p964_p11)
}
  0xae   : > { %766 = dma.vmem_to_hbm [thread:$0]  (%p1173_p9), %s1516_s29, 128, %s1521_s15, %s1532_s8  }
  0xaf   : > { %s968_s25 = scalar_lea.vmem %s1523_s7, 128  ;;  %s1084_s26 = smov [#allocation8]  }
  0xb0   : > { %p969_p13 = scmp.ne.s32.totalorder %s1523_s7, %s968_s25  ;;  %s972_s20 = sshll.u32 %s1084_s26, 4  ;;  %s973_s20 = int_to_ptr.vmem [resolvable:$false] %s972_s20 }
  0xb1   : > { %s974_s6 = scalar_lea.vmem %s973_s20, 256  ;;  %p975_p2 = scmp.lt.s32.totalorder %s1523_s7, %s973_s20 }
  0xb2   : > { %p970_p0 = pnand %p969_p13, %p1173_p9  ;;  %p976_p3 = scmp.lt.s32.totalorder %s974_s6, %s968_s25 }
  0xb4   : > { %p971_p1 = pneg %p970_p0  ;;  %p977_p4 = por %p976_p3, %p975_p2 }
  0xb6   : > { %p978_p5 = pnand %p977_p4, %p971_p1 }
  0xb8   : > { %981 = shalt.err (!%p978_p5)
}
  0xb9   : > { %s982_s29 = scalar_lea.hbm %s1528_s24, 128  ;;  %s986_s10 = scalar_lea.hbm %s1611_s3, 512 }
  0xba   : > { %p983_p6 = scmp.ne.s32.totalorder %s1528_s24, %s982_s29  ;;  %p987_p10 = scmp.lt.u32.totalorder %s1528_s24, %s1611_s3 }
  0xbb   : > { %p988_p11 = scmp.lt.u32.totalorder %s986_s10, %s982_s29  ;;  %p990_p0 = scmp.lt.u32.totalorder %s982_s29, %s1528_s24 }
  0xbc   : > { %p984_p7 = pnand %p983_p6, %p1173_p9 }
  0xbd   : > { %p989_p13 = por %p988_p11, %p987_p10 }
  0xbe   : > { %p985_p8 = pneg %p984_p7 }
  0xbf   : > { %p991_p1 = por %p990_p0, %p989_p13 }
  0xc1   : > { %p992_p2 = pnand %p991_p1, %p985_p8 }
  0xc3   : > { %995 = shalt.err (!%p992_p2)
}
  0xc4   : > { %767 = dma.vmem_to_hbm [thread:$0]  (%p1173_p9), %s1523_s7, 128, %s1528_s24, %s1532_s8  }
  0xc5 PF: > { %p781_p3 = scmp.ge.s32.totalorder %s1070_s19, 2  ;;  %s593_s21 = sand.u32 1, %s1042_s12  }
  0xc6   : > { %s594_s18 = scalar_lea.sflag [#allocation4], %s593_s21 }
  0xc7   : > { %p772_p4 = pnand %p781_p3, %p1182_p12 }
  0xc9   : > { %1033 = dma.done.wait (!%p772_p4), %s594_s18, 512  }
  0xca   : > { %1035 = vsyncadd (!%p772_p4), %s594_s18, 4294966784  ;;  %s1623_s11 = sadd.s32 4294967294, %s1070_s19  }
  0xcb   : > { %s602_s22 = sand.u32 1, %s1623_s11  }
  0xcc   : > { %s603_s23 = scalar_lea.sflag [#allocation7], %s602_s22 }
  0xcd   : > { %1037 = dma.done.wait (!%p772_p4), %s603_s23, 256  }
  0xce   : > { %1039 = vsyncadd (!%p772_p4), %s603_s23, 4294967040  ;;  %s23_s19 = sadd.s32 1, %s1070_s19   ;;  %s1624_s16 = sld [smem:[#allocation15_spill]] }
  0xcf   : > { %p20_p9 = scmp.ge.s32.totalorder %s23_s19, 6   ;;  %s1625_s27 = sld [smem:[#allocation16_spill]] }
  0xd0   : > { %s1626_s18 = sld [smem:[#allocation17_spill]]  ;;  %s1627_s12 = smov %s1046_s13 }
  0xd1   : > { %s1628_s13 = smov %s1050_s14  ;;  %s1629_s14 = smov %s1187_s5 }
  0xd2   : > { %s1630_s15 = smov %s1062_s17  ;;  %22 = sbr.rel (!%p20_p9) target bundleno = 9 (0x9), region = 106 }
  0xd5   : > { %s1631_s17 = smov %s1625_s27 }
  0xd9   :  { %617 = vsyncpa [#allocation3], 1 }
  0xda   :  { %619 = vsyncpa [#allocation3 + $0x1], 1 }
  0xdb   :  { %620 = vsyncpa [#allocation4], 1 }
  0xdc   :  { %622 = vsyncpa [#allocation4 + $0x1], 1 }
  0xdd   :  { %623 = vsyncpa [#allocation7], 1 }
  0xde   :  { %625 = vsyncpa [#allocation7 + $0x1], 1 }

</bundles_post_ra>
